<compile_context>
chip_gen: v5e
topology: v5e:2x2
jax: 0.10.0
libtpu: 0.0.40
codegen_flags: <defaults>
</compile_context>

<pallas_src>
import math

import jax
import jax.numpy as jnp
from jax.experimental import pallas as pl
from jax.experimental.pallas import tpu as pltpu


def _speaker_embedding_kernel(x_ref, w_ref, a1_ref, a2_ref, c2_ref, out_ref, acc_ref):
    """One (batch-tile, embed-tile, reduce-tile) grid step.

    x_ref  : (TB, TF)  input tile
    w_ref  : (TF, TE)  fc weight tile (pre-transposed to (in_dim, embed_dim))
    a1_ref : (1, TF)   BN1 scale  = gamma1 / sqrt(var1 + eps)
    a2_ref : (1, TE)   BN2 scale  = gamma2 / sqrt(var2 + eps)
    c2_ref : (1, TE)   fused shift = (W @ c1 + bias) * a2 + c2
    out_ref: (TB, TE)  output tile
    acc_ref: (TB, TE)  f32 accumulator scratch (lives across the reduce axis)
    """
    kk = pl.program_id(2)

    @pl.when(kk == 0)
    def _():
        acc_ref[...] = jnp.zeros_like(acc_ref)

    # BN1 folded into a per-input-feature scale on the x tile; the BN1 shift
    # is folded into c2_ref by the wrapper, so no broadcasted add is needed.
    xs = x_ref[...] * a1_ref[...]
    acc_ref[...] += jnp.dot(xs, w_ref[...], preferred_element_type=jnp.float32)

    @pl.when(kk == pl.num_programs(2) - 1)
    def _():
        out_ref[...] = (acc_ref[...] * a2_ref[...] + c2_ref[...]).astype(out_ref.dtype)


def _round_up(v, m):
    return (v + m - 1) // m * m


def speaker_embedding_forward(
    x,
    fc_weight, fc_bias,
    bn1_gamma, bn1_beta, bn1_mean, bn1_var,
    bn2_gamma, bn2_beta, bn2_mean, bn2_var,
    *,
    eps=1e-5,
    block_b=256, block_e=256, block_f=512,
):
    """Pallas-backed eval-mode forward of SpeakerEmbedding."""
    B, F = x.shape
    E, F2 = fc_weight.shape
    assert F == F2 and fc_bias.shape == (E,)

    f32 = jnp.float32
    # Fold BatchNorm1d (eval mode) into per-feature affine transforms.
    a1 = bn1_gamma.astype(f32) * jax.lax.rsqrt(bn1_var.astype(f32) + eps)   # (F,)
    c1 = bn1_beta.astype(f32) - bn1_mean.astype(f32) * a1                   # (F,)
    a2 = bn2_gamma.astype(f32) * jax.lax.rsqrt(bn2_var.astype(f32) + eps)   # (E,)
    c2 = bn2_beta.astype(f32) - bn2_mean.astype(f32) * a2                   # (E,)
    # Fold BN1 shift + linear bias + BN2 into a single per-output-channel shift.
    c2_eff = (fc_weight.astype(f32) @ c1 + fc_bias.astype(f32)) * a2 + c2   # (E,)

    wt = fc_weight.T                                                        # (F, E)

    # Tile sizes: lane/sublane aligned; use the (rounded) full dim when small.
    tb = min(block_b, _round_up(B, 8))
    tf = min(block_f, _round_up(F, 128))
    te = min(block_e, _round_up(E, 128))
    Bp, Fp, Ep = _round_up(B, tb), _round_up(F, tf), _round_up(E, te)

    # Zero-padding is a no-op when the shapes are already tile-aligned.
    xp = jnp.pad(x, ((0, Bp - B), (0, Fp - F)))
    wtp = jnp.pad(wt, ((0, Fp - F), (0, Ep - E)))
    a1p = jnp.pad(a1, (0, Fp - F)).reshape(1, Fp)
    a2p = jnp.pad(a2, (0, Ep - E)).reshape(1, Ep)
    c2p = jnp.pad(c2_eff, (0, Ep - E)).reshape(1, Ep)

    grid = (Bp // tb, Ep // te, Fp // tf)

    itemsize = jnp.dtype(x.dtype).itemsize
    out = pl.pallas_call(
        _speaker_embedding_kernel,
        out_shape=jax.ShapeDtypeStruct((Bp, Ep), x.dtype),
        grid_spec=pltpu.PrefetchScalarGridSpec(
            num_scalar_prefetch=0,
            grid=grid,
            in_specs=[
                pl.BlockSpec((tb, tf), lambda i, j, k: (i, k)),   # x tile
                pl.BlockSpec((tf, te), lambda i, j, k: (k, j)),   # W^T tile
                pl.BlockSpec((1, tf), lambda i, j, k: (0, k)),    # BN1 scale
                pl.BlockSpec((1, te), lambda i, j, k: (0, j)),    # BN2 scale
                pl.BlockSpec((1, te), lambda i, j, k: (0, j)),    # fused shift
            ],
            out_specs=pl.BlockSpec((tb, te), lambda i, j, k: (i, j)),
            scratch_shapes=[pltpu.VMEM((tb, te), jnp.float32)],
        ),
        compiler_params=pltpu.CompilerParams(
            dimension_semantics=("parallel", "parallel", "arbitrary"),
        ),
        cost_estimate=pl.CostEstimate(
            flops=2 * Bp * Fp * Ep,
            transcendentals=0,
            bytes_accessed=itemsize * (Bp * Fp + Fp * Ep + Bp * Ep),
        ),
    )(xp, wtp, a1p, a2p, c2p)

    return out[:B, :E]


def _reference(x, fc_weight, fc_bias, g1, b1, m1, v1, g2, b2, m2, v2, eps=1e-5):
    """Pure-JAX reference mirroring the PyTorch module in eval mode."""
    h = (x - m1) * jax.lax.rsqrt(v1 + eps) * g1 + b1
    y = h @ fc_weight.T + fc_bias
    return (y - m2) * jax.lax.rsqrt(v2 + eps) * g2 + b2


if __name__ == "__main__":
    # Small shapes consistent with the module (pooled-stats vector -> embedding).
    B, in_dim, embed_dim = 12, 768, 256

    key = jax.random.PRNGKey(0)
    ks = jax.random.split(key, 11)

    x = jax.random.normal(ks[0], (B, in_dim), dtype=jnp.float32)

    bound = 1.0 / math.sqrt(in_dim)
    fc_weight = jax.random.uniform(ks[1], (embed_dim, in_dim), dtype=jnp.float32,
                                   minval=-bound, maxval=bound)
    fc_bias = jax.random.uniform(ks[2], (embed_dim,), dtype=jnp.float32,
                                 minval=-bound, maxval=bound)

    bn1_gamma = 1.0 + 0.1 * jax.random.normal(ks[3], (in_dim,), dtype=jnp.float32)
    bn1_beta = 0.1 * jax.random.normal(ks[4], (in_dim,), dtype=jnp.float32)
    bn1_mean = 0.2 * jax.random.normal(ks[5], (in_dim,), dtype=jnp.float32)
    bn1_var = 0.5 + jax.random.uniform(ks[6], (in_dim,), dtype=jnp.float32)

    bn2_gamma = 1.0 + 0.1 * jax.random.normal(ks[7], (embed_dim,), dtype=jnp.float32)
    bn2_beta = 0.1 * jax.random.normal(ks[8], (embed_dim,), dtype=jnp.float32)
    bn2_mean = 0.2 * jax.random.normal(ks[9], (embed_dim,), dtype=jnp.float32)
    bn2_var = 0.5 + jax.random.uniform(ks[10], (embed_dim,), dtype=jnp.float32)

    out = speaker_embedding_forward(
        x, fc_weight, fc_bias,
        bn1_gamma, bn1_beta, bn1_mean, bn1_var,
        bn2_gamma, bn2_beta, bn2_mean, bn2_var,
        block_f=256,   # exercise the reduction grid (grid = (1, 1, 3)) at this small shape
    )
    out = jax.block_until_ready(out)

    ref = _reference(x, fc_weight, fc_bias,
                     bn1_gamma, bn1_beta, bn1_mean, bn1_var,
                     bn2_gamma, bn2_beta, bn2_mean, bn2_var)

    assert out.shape == (B, embed_dim)
    err = float(jnp.max(jnp.abs(out - ref)))
    assert err < 2e-3, f"mismatch vs reference: max abs err = {err}"

    print("KERNEL_OK")
</pallas_src>

<mosaic_0001>
module attributes {stable_mosaic.version = 11 : i64} {
  func.func @_speaker_embedding_kernel(%arg0: i32, %arg1: i32, %arg2: i32, %arg3: memref<16x256xf32, #tpu.memory_space<vmem>>, %arg4: memref<256x256xf32, #tpu.memory_space<vmem>>, %arg5: memref<1x256xf32, #tpu.memory_space<vmem>>, %arg6: memref<1x256xf32, #tpu.memory_space<vmem>>, %arg7: memref<1x256xf32, #tpu.memory_space<vmem>>, %arg8: memref<16x256xf32, #tpu.memory_space<vmem>>, %arg9: memref<16x256xf32, #tpu.memory_space<vmem>>) attributes {dimension_semantics = [#tpu.dimension_semantics<parallel>, #tpu.dimension_semantics<parallel>, #tpu.dimension_semantics<arbitrary>], iteration_bounds = array<i64: 1, 1, 3>, scalar_prefetch = 0 : i64, scratch_operands = 1 : i64, tpu.core_type = #tpu.core_type<tc>, window_params = [{transform_indices = @transform_0, window_bounds = array<i64: 16, 256>}, {transform_indices = @transform_1, window_bounds = array<i64: 256, 256>}, {transform_indices = @transform_2, window_bounds = array<i64: 1, 256>}, {transform_indices = @transform_3, window_bounds = array<i64: 1, 256>}, {transform_indices = @transform_4, window_bounds = array<i64: 1, 256>}, {transform_indices = @transform_5, window_bounds = array<i64: 16, 256>}]} {
    %c0_i32 = arith.constant 0 : i32
    %0 = arith.cmpi eq, %arg2, %c0_i32 : i32
    %1 = arith.extui %0 : i1 to i32
    %c0_i32_0 = arith.constant 0 : i32
    %2 = arith.cmpi ne, %1, %c0_i32_0 : i32
    scf.if %2 {
      %cst_11 = arith.constant 0.000000e+00 : f32
      %15 = vector.broadcast %cst_11 : f32 to vector<16x256xf32>
      %c0_12 = arith.constant 0 : index
      %c0_13 = arith.constant 0 : index
      %16 = vector.load %arg9[%c0_12, %c0_13] : memref<16x256xf32, #tpu.memory_space<vmem>>, vector<16x256xf32>
      tpu.vector_store %arg9[%c0_12, %c0_13], %15 {strides = array<i32>} : memref<16x256xf32, #tpu.memory_space<vmem>>, vector<16x256xf32>,
    } else {
    }
    %c0 = arith.constant 0 : index
    %c0_1 = arith.constant 0 : index
    %3 = vector.load %arg3[%c0, %c0_1] : memref<16x256xf32, #tpu.memory_space<vmem>>, vector<16x256xf32>
    %c0_2 = arith.constant 0 : index
    %c0_3 = arith.constant 0 : index
    %4 = vector.load %arg5[%c0_2, %c0_3] : memref<1x256xf32, #tpu.memory_space<vmem>>, vector<1x256xf32>
    %5 = vector.broadcast %4 : vector<1x256xf32> to vector<16x256xf32>
    %6 = arith.mulf %3, %5 : vector<16x256xf32>
    %c0_4 = arith.constant 0 : index
    %c0_5 = arith.constant 0 : index
    %7 = vector.load %arg9[%c0_4, %c0_5] : memref<16x256xf32, #tpu.memory_space<vmem>>, vector<16x256xf32>
    %c0_6 = arith.constant 0 : index
    %c0_7 = arith.constant 0 : index
    %8 = vector.load %arg4[%c0_6, %c0_7] : memref<256x256xf32, #tpu.memory_space<vmem>>, vector<256x256xf32>
    %cst = arith.constant dense<0.000000e+00> : vector<16x256xf32>
    %9 = tpu.matmul %6, %8, %cst {dimension_numbers = #tpu.dot_dimension_numbers<[1], [0], [0], [1], [0, 0, 1, 1], [], []>} : vector<16x256xf32>, vector<256x256xf32>, vector<16x256xf32> -> vector<16x256xf32>
    %10 = arith.addf %7, %9 : vector<16x256xf32>
    %c0_8 = arith.constant 0 : index
    %c0_9 = arith.constant 0 : index
    %11 = vector.load %arg9[%c0_8, %c0_9] : memref<16x256xf32, #tpu.memory_space<vmem>>, vector<16x256xf32>
    tpu.vector_store %arg9[%c0_8, %c0_9], %10 {strides = array<i32>} : memref<16x256xf32, #tpu.memory_space<vmem>>, vector<16x256xf32>,
    %c2_i32 = arith.constant 2 : i32
    %12 = arith.cmpi eq, %arg2, %c2_i32 : i32
    %13 = arith.extui %12 : i1 to i32
    %c0_i32_10 = arith.constant 0 : i32
    %14 = arith.cmpi ne, %13, %c0_i32_10 : i32
    scf.if %14 {
      %c0_11 = arith.constant 0 : index
      %c0_12 = arith.constant 0 : index
      %15 = vector.load %arg9[%c0_11, %c0_12] : memref<16x256xf32, #tpu.memory_space<vmem>>, vector<16x256xf32>
      %c0_13 = arith.constant 0 : index
      %c0_14 = arith.constant 0 : index
      %16 = vector.load %arg6[%c0_13, %c0_14] : memref<1x256xf32, #tpu.memory_space<vmem>>, vector<1x256xf32>
      %17 = vector.broadcast %16 : vector<1x256xf32> to vector<16x256xf32>
      %18 = arith.mulf %15, %17 : vector<16x256xf32>
      %c0_15 = arith.constant 0 : index
      %c0_16 = arith.constant 0 : index
      %19 = vector.load %arg7[%c0_15, %c0_16] : memref<1x256xf32, #tpu.memory_space<vmem>>, vector<1x256xf32>
      %20 = vector.broadcast %19 : vector<1x256xf32> to vector<16x256xf32>
      %21 = arith.addf %18, %20 : vector<16x256xf32>
      %c0_17 = arith.constant 0 : index
      %c0_18 = arith.constant 0 : index
      %22 = vector.load %arg8[%c0_17, %c0_18] : memref<16x256xf32, #tpu.memory_space<vmem>>, vector<16x256xf32>
      tpu.vector_store %arg8[%c0_17, %c0_18], %21 {strides = array<i32>} : memref<16x256xf32, #tpu.memory_space<vmem>>, vector<16x256xf32>,
    } else {
    }
    return
  }
  func.func @transform_0(%arg0: i32, %arg1: i32, %arg2: i32) -> (i32, i32) {
    %c0_i32 = arith.constant 0 : i32
    return %arg0, %arg2 : i32, i32
  }
  func.func @transform_1(%arg0: i32, %arg1: i32, %arg2: i32) -> (i32, i32) {
    %c0_i32 = arith.constant 0 : i32
    return %arg2, %arg1 : i32, i32
  }
  func.func @transform_2(%arg0: i32, %arg1: i32, %arg2: i32) -> (i32, i32) {
    %c0_i32 = arith.constant 0 : i32
    %c0_i32_0 = arith.constant 0 : i32
    return %c0_i32, %arg2 : i32, i32
  }
  func.func @transform_3(%arg0: i32, %arg1: i32, %arg2: i32) -> (i32, i32) {
    %c0_i32 = arith.constant 0 : i32
    %c0_i32_0 = arith.constant 0 : i32
    return %c0_i32, %arg1 : i32, i32
  }
  func.func @transform_4(%arg0: i32, %arg1: i32, %arg2: i32) -> (i32, i32) {
    %c0_i32 = arith.constant 0 : i32
    %c0_i32_0 = arith.constant 0 : i32
    return %c0_i32, %arg1 : i32, i32
  }
  func.func @transform_5(%arg0: i32, %arg1: i32, %arg2: i32) -> (i32, i32) {
    %c0_i32 = arith.constant 0 : i32
    return %arg0, %arg1 : i32, i32
  }
}

</mosaic_0001>

<bundles_post_ra>
// kernel: tpu_custom_call.1
= control target key start
LH: loop header
LB: loop body
LE: loop exit
PB: predicated region body
PF: predicated region fallthrough
CT: control target
= control target key end

     0   :  { %s1367_s0 = inlined_call_operand.hbm [shape: f32[16,768], index: 0, kind: input, shape index: {}]   ;;  %s1368_s1 = inlined_call_operand.hbm [shape: f32[768,256], index: 1, kind: input, shape index: {}]   ;;  %s1369_s2 = inlined_call_operand.hbm [shape: f32[1,768], index: 2, kind: input, shape index: {}]   ;;  %s1370_s3 = inlined_call_operand.vmem [shape: f32[1,256], index: 3, kind: input, shape index: {}]   ;;  %s1371_s4 = inlined_call_operand.hbm [shape: f32[1,256], index: 4, kind: input, shape index: {}]   ;;  %s1372_s5 = inlined_call_operand.hbm [shape: f32[16,256], index: 5, kind: output, shape index: {}]  }
   0x1   :  { %1378 = sst [smem:[#allocation20_spill]] %s1368_s1 }
   0x2   :  { %1379 = sst [smem:[#allocation21_spill]] %s1371_s4 }
   0x3   :  { %10 = vsyncpa [#allocation4], 0 }
   0x4   :  { %12 = vsyncpa [#allocation4 + $0x1], 0 }
   0x5   :  { %13 = vsyncpa [#allocation7], 0 }
   0x6   :  { %15 = vsyncpa [#allocation7 + $0x1], 0 }
   0x7   :  { %16 = vsyncpa [#allocation10], 0 }
   0x8   :  { %17 = vsyncpa [#allocation5], 0  ;;  %s1142_s18 = smov 0   ;;  %s1144_s19 = smov 0  }
   0x9   :  { %s1146_s20 = smov 0   ;;  %s1148_s21 = smov 0  }
   0xa   :  { %s1150_s22 = smov 0   ;;  %s1152_s23 = smov 0  }
   0xb LB: > { %1380 = sst [smem:[#allocation16_spill]] %s1090_s20  ;;  %s35_s24 = sadd.s32 1, %s1098_s22  ;;  %s1102_s23 = sphi %s1152_s23, %s23_s23   ;;  %s1098_s22 = sphi %s1150_s22, %s1398_s22   ;;  %s1094_s21 = sphi %s1148_s21, %s1397_s21   ;;  %s1090_s20 = sphi %s1146_s20, %s1393_s20   ;;  %s1086_s19 = sphi %s1144_s19, %s1396_s19   ;;  %s1082_s18 = sphi %s1142_s18, %s1395_s18  }
   0xc   : > { %1381 = sst [smem:[#allocation17_spill]] %s1102_s23  ;;  %s51_s25 = sadd.s32 1, %s1090_s20 }
   0xd   : > { %p36_p0 = scmp.ge.s32.totalorder %s35_s24, 3  ;;  %p58_p1 = scmp.ne.s32.totalorder %s1090_s20, %s1086_s19 }
   0xe   : > { %p59_p2 = scmp.eq.s32.totalorder %s1102_s23, 0  ;;  %p832_p4 = scmp.lt.s32.totalorder %s1102_s23, 3 }
   0xf   : > { %s1400_s24 = smov (%p36_p0, %s35_s24), 0  ;;  %s1183_s27 = sand.u32 1, %s1090_s20  }
  0x10   : > { %1382 = sst [smem:[#allocation18_spill]] %s1400_s24  ;;  %p60_p3 = por %p59_p2, %p58_p1 }
  0x11   : > { %s47_s26 = ssub.s32 %s1098_s22, %s1400_s24  ;;  %s269_s30 = sand.u32 1, %s1102_s23  }
  0x12   : > { %p49_p5 = scmp.eq.s32.totalorder %s47_s26, 0  ;;  %p1185_p6 = pnand %p832_p4, %p60_p3 }
  0x13   : > { %s783_s6 = sshll.u32 %s1183_s27, 9  ;;  %s802_s7 = sshll.u32 %s1098_s22, 9 }
  0x14   : > { %s1190_s29 = scalar_select %p49_p5, %s1090_s20, %s51_s25  }
  0x15   : > { %s1385_s1 = sld [smem:[#allocation20_spill]]  ;;  %s273_s11 = scalar_lea.vmem [#allocation6], %s783_s6 }
  0x16   : > { %1384 = sst [smem:[#allocation19_spill]] %s1190_s29  ;;  %s284_s12 = sshll.u32 %s273_s11, 4  ;;  %s285_s12 = int_to_ptr.vmem [resolvable:$true] %s284_s12 }
  0x17   : > { %s1198_s14 = scalar_lea.sflag [#allocation7], %s269_s30  ;;  %s1373_s15 = smov 256  }
  0x18   : > { %s1374_s16 = smov 16   ;;  %s1207_s17 = sadd.s32 4294967295, %s1102_s23  }
  0x19   : > { %p64_p7 = scmp.ne.s32.totalorder %s1086_s19, %s1082_s18  ;;  %p65_p8 = scmp.eq.s32.totalorder %s1207_s17, 0 }
  0x1a   : > { %p776_p9 = scmp.ge.s32.totalorder %s1102_s23, 1  ;;  %p209_p10 = scmp.lt.s32.totalorder %s1102_s23, 4 }
  0x1b   : > { %s281_s10 = scalar_lea.hbm %s1385_s1, %s802_s7  ;;  %p1216_p11 = por %p65_p8, %p64_p7 }
  0x1c   : > { %s282_s13 = sshll.u32 %s281_s10, 4  ;;  %p1220_p12 = pnand %p776_p9, %p209_p10  ;;  %s283_s13 = int_to_ptr.hbm [resolvable:$true] %s282_s13 }
  0x1d   : > { %827 = dma.hbm_to_vmem [thread:$0]  (!%p1185_p6), %s283_s13, 8192, %s285_s12, %s1198_s14, %s1373_s15, %s1373_s15, %s1374_s16  }
  0x1e   : > { %s1388_s4 = sld [smem:[#allocation21_spill]]  ;;  %p817_p13 = pneg %p1220_p12 }
  0x1f   : > { %s1106_s18 = smov [#allocation9]   ;;  %s780_s9 = sshll.u32 %s1183_s27, 5 }
  0x20   : > { %s233_s8 = sshll.u32 %s1106_s18, 4  ;;  %p818_p0 = pnand %p817_p13, %p65_p8  ;;  %s234_s8 = int_to_ptr.vmem [resolvable:$true] %s233_s8 }
  0x21   : > { %s800_s10 = sshll.u32 %s1098_s22, 4  ;;  %s248_s6 = scalar_lea.vmem [#allocation3], %s780_s9 }
  0x22   : > { %s256_s13 = scalar_lea.hbm %s1367_s0, %s800_s10  ;;  %s259_s15 = sshll.u32 %s248_s6, 4  ;;  %s260_s15 = int_to_ptr.vmem [resolvable:$true] %s259_s15 }
  0x23   : > { %s257_s30 = sshll.u32 %s256_s13, 4  ;;  %s787_s16 = sshll.u32 %s1183_s27, 1  ;;  %s258_s30 = int_to_ptr.hbm [resolvable:$true] %s257_s30 }
  0x24   : > { %s231_s7 = sshll.u32 %s1388_s4, 4  ;;  %s245_s18 = scalar_lea.sflag [#allocation4], %s1183_s27  ;;  %s232_s7 = int_to_ptr.hbm [resolvable:$true] %s231_s7 }
  0x25   : > { %820 = dma.hbm_to_vmem [thread:$0]  (!%p818_p0), %s232_s7, 32, %s234_s8, [#allocation10]  }
  0x26   : > { %s1107_s1 = smov 768   ;;  %s1389_s4 = smov 16  }
  0x27   : > { %s1390_s24 = smov 256   ;;  %s788_s29 = sshll.u32 %s1098_s22, 1 }
  0x28   : > { %824 = dma.hbm_to_vmem [thread:$0]  (!%p1185_p6), %s258_s30, 512, %s260_s15, %s245_s18, %s1107_s1, %s1390_s24, %s1389_s4  }
  0x29   : > { %s302_s10 = scalar_lea.hbm %s1369_s2, %s788_s29  ;;  %s298_s7 = scalar_lea.vmem [#allocation8], %s787_s16 }
  0x2a   : > { %s306_s8 = sshll.u32 %s298_s7, 4  ;;  %s304_s11 = sshll.u32 %s302_s10, 4  ;;  %s307_s8 = int_to_ptr.vmem [resolvable:$true] %s306_s8  ;;  %s305_s11 = int_to_ptr.hbm [resolvable:$true] %s304_s11 }
  0x2b   : > { %830 = dma.hbm_to_vmem [thread:$0]  (!%p1185_p6), %s305_s11, 32, %s307_s8, %s1198_s14  }
  0x2c   : > { %315 = sbr.rel (%p1220_p12) target bundleno = 264 (0x108), region = 40  ;;  %s317_s27 = sand.u32 (!%p1220_p12), 1, %s1086_s19  }
  0x2d   : > { %s790_s9 = sshll.u32 (!%p1220_p12), %s317_s27, 5  ;;  %s318_s1 = scalar_lea.sflag (!%p1220_p12), [#allocation4], %s317_s27 }
  0x2e   : > { %s1252_s4 = scalar_lea.vmem (!%p1220_p12), [#allocation3], %s790_s9 }
  0x31   : > { %1065 = dma.done.wait (%p1216_p11), %s318_s1, 512  }
  0x32   : > { %1067 = vsyncadd (%p1216_p11), %s318_s1, 4294966784  ;;  %s327_s20 = sand.u32 1, %s1207_s17   ;;  %s791_s23 = sshll.u32 %s317_s27, 9 }
  0x33   : > { %s328_s24 = scalar_lea.sflag [#allocation7], %s327_s20  ;;  %s1259_s28 = scalar_lea.vmem [#allocation6], %s791_s23 }
  0x34   : > { %1069 = dma.done.wait (%p1216_p11), %s328_s24, 8224  }
  0x35   : > { %1071 = vsyncadd (%p1216_p11), %s328_s24, 4294959072  ;;  %s792_s29 = sshll.u32 %s317_s27, 1 }
  0x36   : > { %s1265_s14 = scalar_lea.vmem [#allocation8], %s792_s29 }
  0x37   : > { %1073 = dma.done.wait (%p65_p8), [#allocation10], 32  }
  0x38   : > { %1075 = vsyncadd (%p65_p8), [#allocation10], 4294967264  ;;  %p794_p1 = scmp.ne.s32.totalorder %s1094_s21, 0 }
  0x3a   : > { %399 = sbr.rel (%p794_p1) target bundleno = 68 (0x44), region = 60 }
  0x3f   : > { %v1108_v0 = vmov 0.0  }
  0x40   : > { %400 = vst [vmem:[#allocation2 + $0x10] sm:$0xff] %v1108_v0 }
  0x41   : > { %401 = vst [vmem:[#allocation2] sm:$0xff] %v1108_v0 }
  0x42   : > { %402 = vst [vmem:[#allocation2 + $0x18] sm:$0xff] %v1108_v0 }
  0x43   : > { %403 = vst [vmem:[#allocation2 + $0x8] sm:$0xff] %v1108_v0 }
  0x44 PF: > { %v453_v1 = vld [vmem:[%s1259_s28 + $0xf8] sm:$0xff]  ;;  %v451_v3 = vld [vmem:[%s1259_s28 + $0xe8] sm:$0xff]  ;;  %v452_v7 = vld [vmem:[%s1259_s28 + $0xf0] sm:$0xff]  ;;  %p795_p2 = scmp.ne.s32.totalorder %s1094_s21, 2 }
  0x45   : > { %v485_v2 = vld [vmem:[%s1259_s28 + $0x1f8] sm:$0xff]  ;;  %532 = vmatpush.msra.mxu2 %v453_v1  ;;  %v483_v4 = vld [vmem:[%s1259_s28 + $0x1e8] sm:$0xff]  ;;  %v484_v8 = vld [vmem:[%s1259_s28 + $0x1f0] sm:$0xff]  ;;  %486 = vmatpush.msra.mxu0 %v452_v7 }
  0x46   : > { %555 = vmatpush.msra.mxu3 %v485_v2  ;;  %v449_v5 = vld [vmem:[%s1259_s28 + $0xd8] sm:$0xff]  ;;  %v450_v9 = vld [vmem:[%s1259_s28 + $0xe0] sm:$0xff]  ;;  %509 = vmatpush.msra.mxu1 %v484_v8  ;;  %v447_v11 = vld [vmem:[%s1259_s28 + $0xc8] sm:$0xff] }
  0x47   : > { %v481_v6 = vld [vmem:[%s1259_s28 + $0x1d8] sm:$0xff]  ;;  %533 = vmatpush.msra.mxu2 %v451_v3  ;;  %v482_v10 = vld [vmem:[%s1259_s28 + $0x1e0] sm:$0xff]  ;;  %v479_v12 = vld [vmem:[%s1259_s28 + $0x1c8] sm:$0xff]  ;;  %487 = vmatpush.msra.mxu0 %v450_v9 }
  0x48   : > { %556 = vmatpush.msra.mxu3 %v483_v4  ;;  %v448_v13 = vld [vmem:[%s1259_s28 + $0xd0] sm:$0xff]  ;;  %510 = vmatpush.msra.mxu1 %v482_v10  ;;  %v445_v15 = vld [vmem:[%s1259_s28 + $0xb8] sm:$0xff]  ;;  %v446_v17 = vld [vmem:[%s1259_s28 + $0xc0] sm:$0xff] }
  0x49   : > { %534 = vmatpush.msra.mxu2 %v449_v5  ;;  %v480_v14 = vld [vmem:[%s1259_s28 + $0x1d0] sm:$0xff]  ;;  %v477_v16 = vld [vmem:[%s1259_s28 + $0x1b8] sm:$0xff]  ;;  %v478_v18 = vld [vmem:[%s1259_s28 + $0x1c0] sm:$0xff]  ;;  %488 = vmatpush.msra.mxu0 %v448_v13 }
  0x4a   : > { %557 = vmatpush.msra.mxu3 %v481_v6  ;;  %511 = vmatpush.msra.mxu1 %v480_v14  ;;  %v443_v19 = vld [vmem:[%s1259_s28 + $0xa8] sm:$0xff]  ;;  %v444_v21 = vld [vmem:[%s1259_s28 + $0xb0] sm:$0xff]  ;;  %v441_v23 = vld [vmem:[%s1259_s28 + $0x98] sm:$0xff] }
  0x4b   : > { %535 = vmatpush.msra.mxu2 %v447_v11  ;;  %v475_v20 = vld [vmem:[%s1259_s28 + $0x1a8] sm:$0xff]  ;;  %v476_v22 = vld [vmem:[%s1259_s28 + $0x1b0] sm:$0xff]  ;;  %489 = vmatpush.msra.mxu0 %v446_v17  ;;  %v473_v24 = vld [vmem:[%s1259_s28 + $0x198] sm:$0xff] }
  0x4c   : > { %558 = vmatpush.msra.mxu3 %v479_v12  ;;  %512 = vmatpush.msra.mxu1 %v478_v18  ;;  %v442_v25 = vld [vmem:[%s1259_s28 + $0xa0] sm:$0xff]  ;;  %v439_v27 = vld [vmem:[%s1259_s28 + $0x88] sm:$0xff]  ;;  %v440_v29 = vld [vmem:[%s1259_s28 + $0x90] sm:$0xff] }
  0x4d   : > { %536 = vmatpush.msra.mxu2 %v445_v15  ;;  %v474_v26 = vld [vmem:[%s1259_s28 + $0x1a0] sm:$0xff]  ;;  %490 = vmatpush.msra.mxu0 %v444_v21  ;;  %v471_v28 = vld [vmem:[%s1259_s28 + $0x188] sm:$0xff]  ;;  %v472_v30 = vld [vmem:[%s1259_s28 + $0x190] sm:$0xff] }
  0x4e   : > { %559 = vmatpush.msra.mxu3 %v477_v16  ;;  %513 = vmatpush.msra.mxu1 %v476_v22  ;;  %v437_v31 = vld [vmem:[%s1259_s28 + $0x78] sm:$0xff]  ;;  %v438_v33 = vld [vmem:[%s1259_s28 + $0x80] sm:$0xff]  ;;  %v435_v35 = vld [vmem:[%s1259_s28 + $0x68] sm:$0xff] }
  0x4f   : > { %537 = vmatpush.msra.mxu2 %v443_v19  ;;  %491 = vmatpush.msra.mxu0 %v442_v25  ;;  %v469_v32 = vld [vmem:[%s1259_s28 + $0x178] sm:$0xff]  ;;  %v470_v34 = vld [vmem:[%s1259_s28 + $0x180] sm:$0xff]  ;;  %v467_v36 = vld [vmem:[%s1259_s28 + $0x168] sm:$0xff] }
  0x50   : > { %560 = vmatpush.msra.mxu3 %v475_v20  ;;  %514 = vmatpush.msra.mxu1 %v474_v26  ;;  %v436_v37 = vld [vmem:[%s1259_s28 + $0x70] sm:$0xff]  ;;  %v433_v39 = vld [vmem:[%s1259_s28 + $0x58] sm:$0xff]  ;;  %v434_v41 = vld [vmem:[%s1259_s28 + $0x60] sm:$0xff] }
  0x51   : > { %538 = vmatpush.msra.mxu2 %v441_v23  ;;  %492 = vmatpush.msra.mxu0 %v440_v29  ;;  %v468_v38 = vld [vmem:[%s1259_s28 + $0x170] sm:$0xff]  ;;  %v465_v40 = vld [vmem:[%s1259_s28 + $0x158] sm:$0xff]  ;;  %v466_v42 = vld [vmem:[%s1259_s28 + $0x160] sm:$0xff] }
  0x52   : > { %561 = vmatpush.msra.mxu3 %v473_v24  ;;  %515 = vmatpush.msra.mxu1 %v472_v30  ;;  %v431_v43 = vld [vmem:[%s1259_s28 + $0x48] sm:$0xff]  ;;  %v432_v45 = vld [vmem:[%s1259_s28 + $0x50] sm:$0xff]  ;;  %v408_v47 = vld [vmem:[%s1265_s14] sm:$0x3] }
  0x53   : > { %539 = vmatpush.msra.mxu2 %v439_v27  ;;  %493 = vmatpush.msra.mxu0 %v438_v33  ;;  %v463_v44 = vld [vmem:[%s1259_s28 + $0x148] sm:$0xff]  ;;  %v464_v46 = vld [vmem:[%s1259_s28 + $0x150] sm:$0xff]  ;;  %v429_v48 = vld [vmem:[%s1259_s28 + $0x38] sm:$0xff]  ;;  %v410_v55 = vperm.slane %v408_v47, 0  ;;  %v411_v56 = vperm.slane %v408_v47, 1 }
  0x54   : > { %562 = vmatpush.msra.mxu3 %v471_v28  ;;  %516 = vmatpush.msra.mxu1 %v470_v34  ;;  %v461_v49 = vld [vmem:[%s1259_s28 + $0x138] sm:$0xff]  ;;  %v430_v50 = vld [vmem:[%s1259_s28 + $0x40] sm:$0xff]  ;;  %v427_v52 = vld [vmem:[%s1259_s28 + $0x28] sm:$0xff] }
  0x55   : > { %540 = vmatpush.msra.mxu2 %v437_v31  ;;  %494 = vmatpush.msra.mxu0 %v436_v37  ;;  %v462_v51 = vld [vmem:[%s1259_s28 + $0x140] sm:$0xff]  ;;  %v459_v53 = vld [vmem:[%s1259_s28 + $0x128] sm:$0xff]  ;;  %v428_v54 = vld [vmem:[%s1259_s28 + $0x30] sm:$0xff] }
  0x56   : > { %563 = vmatpush.msra.mxu3 %v469_v32  ;;  %517 = vmatpush.msra.mxu1 %v468_v38  ;;  %v460_v57 = vld [vmem:[%s1259_s28 + $0x130] sm:$0xff]  ;;  %v404_v58 = vld [vmem:[%s1252_s4] sm:$0xff]  ;;  %v405_v59 = vld [vmem:[%s1252_s4 + $0x8] sm:$0xff] }
  0x57   : > { %541 = vmatpush.msra.mxu2 %v435_v35  ;;  %495 = vmatpush.msra.mxu0 %v434_v41  ;;  %v425_v60 = vld [vmem:[%s1259_s28 + $0x18] sm:$0xff]  ;;  %v426_v62 = vld [vmem:[%s1259_s28 + $0x20] sm:$0xff]  ;;  %v423_v0 = vld [vmem:[%s1259_s28 + $0x8] sm:$0xff]  ;;  %v414_v2 = vmul.f32 %v410_v55, %v404_v58  ;;  %v415_v3 = vmul.f32 %v411_v56, %v405_v59 }
  0x58   : > { %564 = vmatpush.msra.mxu3 %v467_v36  ;;  %518 = vmatpush.msra.mxu1 %v466_v42  ;;  %v457_v61 = vld [vmem:[%s1259_s28 + $0x118] sm:$0xff]  ;;  %v458_v63 = vld [vmem:[%s1259_s28 + $0x120] sm:$0xff]  ;;  %v455_v1 = vld [vmem:[%s1259_s28 + $0x108] sm:$0xff] }
  0x59   : > { %542 = vmatpush.msra.mxu2 %v433_v39  ;;  %496 = vmatpush.msra.mxu0 %v432_v45  ;;  %v424_v4 = vld [vmem:[%s1259_s28 + $0x10] sm:$0xff]  ;;  %v422_v6 = vld [vmem:[%s1259_s28] sm:$0xff]  ;;  %v407_v9 = vld [vmem:[%s1252_s4 + $0x18] sm:$0xff] }
  0x5a   : > { %565 = vmatpush.msra.mxu3 %v465_v40  ;;  %519 = vmatpush.msra.mxu1 %v464_v46  ;;  %v456_v5 = vld [vmem:[%s1259_s28 + $0x110] sm:$0xff]  ;;  %v454_v7 = vld [vmem:[%s1259_s28 + $0x100] sm:$0xff]  ;;  %v417_v11 = vmul.f32 %v411_v56, %v407_v9  ;;  %v420_v23 = vld [vmem:[#allocation2 + $0x18] sm:$0xff] }
  0x5b   : > { %543 = vmatpush.msra.mxu2 %v431_v43  ;;  %497 = vmatpush.msra.mxu0 %v430_v50  ;;  %v406_v8 = vld [vmem:[%s1252_s4 + $0x10] sm:$0xff]  ;;  %v419_v17 = vld [vmem:[#allocation2] sm:$0xff]  ;;  %v421_v27 = vld [vmem:[#allocation2 + $0x8] sm:$0xff] }
  0x5c   : > { %566 = vmatpush.msra.mxu3 %v463_v44  ;;  %520 = vmatpush.msra.mxu1 %v462_v51  ;;  %v416_v10 = vmul.f32 %v410_v55, %v406_v8  ;;  %v418_v13 = vld [vmem:[#allocation2 + $0x10] sm:$0xff] }
  0x5d   : > { %544 = vmatpush.msra.mxu2 %v429_v48  ;;  %498 = vmatpush.msra.mxu0 %v428_v54 }
  0x5e   : > { %567 = vmatpush.msra.mxu3 %v461_v49  ;;  %521 = vmatpush.msra.mxu1 %v460_v57 }
  0x5f   : > { %545 = vmatpush.msra.mxu2 %v427_v52  ;;  %499 = vmatpush.msra.mxu0 %v426_v62 }
  0x60   : > { %568 = vmatpush.msra.mxu3 %v459_v53  ;;  %522 = vmatpush.msra.mxu1 %v458_v63 }
  0x61   : > { %546 = vmatpush.msra.mxu2 %v425_v60  ;;  %500 = vmatpush.msra.mxu0 %v424_v4 }
  0x62   : > { %569 = vmatpush.msra.mxu3 %v457_v61  ;;  %523 = vmatpush.msra.mxu1 %v456_v5 }
  0x63   : > { %547 = vmatpush.msra.mxu2 %v423_v0  ;;  %501 = vmatpush.msra.mxu0 %v422_v6 }
  0x64   : > { %570 = vmatpush.msra.mxu3 %v455_v1  ;;  %548 = vmatmul.f32.vlgmr.msra.gmra.mxu2 %v414_v2 }
  0x65   : > { %571 = vmatmul.f32.vlgmr.msra.gmra.mxu3 %v415_v3  ;;  %524 = vmatpush.msra.mxu1 %v454_v7 }
  0x66   : > { %502 = vmatmul.f32.vlgmr.msra.gmra.mxu0 %v414_v2  ;;  %525 = vmatmul.f32.vlgmr.msra.gmra.mxu1 %v415_v3 }
  0x6c   : > { %551 = vmatmul.f32.gmra.mxu2 %v416_v10 }
  0x6d   : > { %574 = vmatmul.f32.gmra.mxu3 %v417_v11 }
  0x6e   : > { %505 = vmatmul.f32.gmra.mxu0 %v416_v10  ;;  %528 = vmatmul.f32.gmra.mxu1 %v417_v11 }
  0xe3   : > { %v503_v12 = vpop.f32.mrf.mxu0  ;;  %v526_v14 = vpop.f32.mrf.mxu1 }
  0xe4   : > { %v527_v15 = vadd.f32 %v526_v14, %v503_v12 }
  0xe6   : > { %v578_v19 = vadd.f32 %v527_v15, %v418_v13 }
  0xe7   : > { %v549_v16 = vpop.f32.mrf.mxu2 }
  0xe8   : > { %v572_v18 = vpop.f32.mrf.mxu3  ;;  %582 = vst [vmem:[#allocation2 + $0x10] sm:$0xff] %v578_v19 }
  0xe9   : > { %v573_v20 = vadd.f32 %v572_v18, %v549_v16 }
  0xeb   : > { %v579_v21 = vadd.f32 %v573_v20, %v419_v17  ;;  %v506_v22 = vpop.f32.mrf.mxu0  ;;  %v529_v24 = vpop.f32.mrf.mxu1 }
  0xec   : > { %v530_v25 = vadd.f32 %v529_v24, %v506_v22 }
  0xed   : > { %583 = vst [vmem:[#allocation2] sm:$0xff] %v579_v21 }
  0xee   : > { %v580_v29 = vadd.f32 %v530_v25, %v420_v23 }
  0xef   : > { %v552_v26 = vpop.f32.mrf.mxu2 }
  0xf0   : > { %v575_v28 = vpop.f32.mrf.mxu3  ;;  %584 = vst [vmem:[#allocation2 + $0x18] sm:$0xff] %v580_v29 }
  0xf1   : > { %v576_v30 = vadd.f32 %v575_v28, %v552_v26  ;;  %589 = sbr.rel (%p795_p2) target bundleno = 258 (0x102), region = 64 }
  0xf3   : > { %v581_v31 = vadd.f32 %v576_v30, %v421_v27 }
  0xf5   : > { %585 = vst [vmem:[#allocation2 + $0x8] sm:$0xff] %v581_v31 }
  0xf6   : > { %v590_v32 = vld [vmem:[#allocation2 + $0x10] sm:$0xff]  ;;  %v594_v33 = vld [vmem:[%s1370_s3] sm:$0x3]  ;;  %v604_v34 = vld [vmem:[#allocation9] sm:$0x3] }
  0xf7   : > { %v596_v35 = vperm.slane %v594_v33, 0  ;;  %v606_v36 = vperm.slane %v604_v34, 0  ;;  %v591_v37 = vld [vmem:[#allocation2] sm:$0xff]  ;;  %v597_v38 = vperm.slane %v594_v33, 1  ;;  %v607_v39 = vperm.slane %v604_v34, 1  ;;  %v592_v40 = vld [vmem:[#allocation2 + $0x18] sm:$0xff] }
  0xf9   : > { %v600_v42 = vmul.f32 %v596_v35, %v590_v32  ;;  %v601_v43 = vmul.f32 %v597_v38, %v591_v37  ;;  %v602_v44 = vmul.f32 %v596_v35, %v592_v40 }
  0xfb   : > { %v610_v46 = vadd.f32 %v606_v36, %v600_v42  ;;  %v611_v47 = vadd.f32 %v607_v39, %v601_v43  ;;  %v612_v48 = vadd.f32 %v606_v36, %v602_v44 }
  0xfc   : > { %v593_v41 = vld [vmem:[#allocation2 + $0x8] sm:$0xff] }
  0xfd   : > { %v603_v45 = vmul.f32 %v597_v38, %v593_v41  ;;  %614 = vst [vmem:[#allocation11] sm:$0xff] %v610_v46 }
  0xfe   : > { %615 = vst [vmem:[#allocation11 + $0x8] sm:$0xff] %v611_v47 }
  0xff   : > { %v613_v49 = vadd.f32 %v607_v39, %v603_v45  ;;  %616 = vst [vmem:[#allocation11 + $0x10] sm:$0xff] %v612_v48 }
 0x101   : > { %617 = vst [vmem:[#allocation11 + $0x18] sm:$0xff] %v613_v49 }
 0x102 PF: > { %p834_p3 = scmp.eq.s32.totalorder %s1207_s17, 2  ;;  %s631_s26 = sshll.u32 %s1372_s5, 4  ;;  %s632_s26 = int_to_ptr.hbm [resolvable:$true] %s631_s26 }
 0x103   : > { %s1109_s12 = smov [#allocation11]   ;;  %s1110_s30 = smov 256  }
 0x104   : > { %s629_s13 = sshll.u32 %s1109_s12, 4  ;;  %s1111_s6 = smov 16   ;;  %s630_s13 = int_to_ptr.vmem [resolvable:$true] %s629_s13 }
 0x105   : > { %814 = dma.vmem_to_hbm [thread:$0]  (%p834_p3), %s630_s13, 512, %s632_s26, [#allocation5], %s1110_s30, %s1110_s30, %s1111_s6  }
 0x106   : > { %1077 = dma.done.wait (%p834_p3), [#allocation5], 512  }
 0x107   : > { %1079 = vsyncadd (%p834_p3), [#allocation5], 4294966784 }
 0x108 PF: > { %s1391_s18 = sld [smem:[#allocation17_spill]]  ;;  %s1397_s21 = smov %s1098_s22 }
 0x109   : > { %s1392_s10 = sld [smem:[#allocation16_spill]] }
 0x10a   : > { %s1393_s20 = sld [smem:[#allocation19_spill]] }
 0x10b   : > { %s1394_s17 = sld [smem:[#allocation18_spill]] }
 0x10e   : > { %s23_s23 = sadd.s32 1, %s1391_s18   ;;  %s1395_s18 = smov %s1086_s19 }
 0x10f   : > { %p20_p4 = scmp.ge.s32.totalorder %s23_s23, 5   ;;  %s1396_s19 = smov %s1392_s10 }
 0x111   : > { %s1398_s22 = smov %s1394_s17  ;;  %22 = sbr.rel (!%p20_p4) target bundleno = 11 (0xb), region = 118 }
 0x116   :  { %648 = vsyncpa [#allocation4], 1 }
 0x117   :  { %650 = vsyncpa [#allocation4 + $0x1], 1 }
 0x118   :  { %651 = vsyncpa [#allocation7], 1 }
 0x119   :  { %653 = vsyncpa [#allocation7 + $0x1], 1 }
 0x11a   :  { %654 = vsyncpa [#allocation10], 1 }
 0x11b   :  { %655 = vsyncpa [#allocation5], 1 }
 0x11c   :  { %657 = vsyncpa [#allocation5 + $0x1], 1 }

</bundles_post_ra>
